<compile_context>
chip_gen: v5e
topology: v5e:2x2
jax: 0.10.0
libtpu: 0.0.40
codegen_flags: <defaults>
</compile_context>

<pallas_src>
import functools

import jax
import jax.numpy as jnp
from jax.experimental import pallas as pl
from jax.experimental.pallas import tpu as pltpu


def _round_up(x, m):
    return ((x + m - 1) // m) * m


def _fused_mlp_kernel(*refs, num_layers):
    # refs = (x_ref, w0, b0, w1, b1, ..., o_ref)
    #   x_ref : (TM, K0_pad)      f32 activations (lane-padded with zeros)
    #   w_l   : (Kl_pad, Nl_pad)  bf16 weights     (zero-padded)
    #   b_l   : (1, Nl_pad)       f32 biases       (zero-padded)
    #   o_ref : (TM, N_out_pad)   f32 final padded output
    x_ref = refs[0]
    o_ref = refs[-1]
    act = x_ref[...]
    for l in range(num_layers):                     # tiny static unrolled loop
        w = refs[1 + 2 * l][...]
        b = refs[2 + 2 * l][...]
        # bf16 operands, f32 accumulation on the MXU.
        h = jnp.dot(act.astype(w.dtype), w, preferred_element_type=jnp.float32)
        act = jnp.maximum(h + b, 0.0)               # ReLU after every layer
    o_ref[...] = act.astype(o_ref.dtype)


def pack_dqn_params(params):
    """Pad (per-layer, to multiples of 128) and cast weights to bf16 ONCE.

    Call at init / after each parameter update - NOT inside the per-step
    forward path. Zero padding + ReLU keeps padded lanes exactly zero through
    every layer, so results are unaffected.
    """
    packed = []
    for (w, b) in params:
        k_pad = _round_up(w.shape[0], 128)
        n_pad = _round_up(w.shape[1], 128)
        w_p = jnp.zeros((k_pad, n_pad), jnp.bfloat16)
        w_p = w_p.at[: w.shape[0], : w.shape[1]].set(w.astype(jnp.bfloat16))
        b_p = jnp.zeros((1, n_pad), jnp.float32)
        b_p = b_p.at[0, : b.shape[0]].set(b.astype(jnp.float32))
        packed.append((w_p, b_p))
    return packed


def _vmem_limit_bytes(tile_rows, k0_pad, packed_params):
    """Footprint-based scoped-VMEM budget, clamped to [32 MiB, 64 MiB]."""
    w_bytes = sum(int(w.size) * w.dtype.itemsize for w, _ in packed_params)
    b_bytes = sum(int(b.size) * b.dtype.itemsize for _, b in packed_params)
    n_out_pad = packed_params[-1][0].shape[1]
    widest = max([k0_pad] + [int(w.shape[1]) for w, _ in packed_params])
    io_bytes = tile_rows * (k0_pad + n_out_pad) * 4 * 2      # double-buffered in/out tiles
    act_bytes = tile_rows * widest * 4 * 3                   # f32/bf16 intermediates headroom
    total = 2 * (w_bytes + b_bytes) + io_bytes + act_bytes + (4 << 20)
    return int(min(max(total, 32 << 20), 64 << 20))


@functools.partial(jax.jit, static_argnames=("n_actions",))
def dqn_forward(x, packed_params, *, n_actions):
    """Fused forward: relu(... relu(relu(x@W0+b0)@W1+b1) ...) in one kernel."""
    B, n_obs = x.shape
    L = len(packed_params)
    k0_pad = packed_params[0][0].shape[0]
    n_out_pad = packed_params[-1][0].shape[1]

    flat_params = []
    for (w_p, b_p) in packed_params:
        flat_params += [w_p, b_p]

    kernel = functools.partial(_fused_mlp_kernel, num_layers=L)
    TM = 512  # batch tile for the large-batch path

    if B <= TM:
        # Small batch: single full-block invocation, everything resident in VMEM.
        B_pad = _round_up(max(B, 8), 8)
        x_p = jnp.pad(x.astype(jnp.float32),
                      ((0, B_pad - B), (0, k0_pad - n_obs)))
        vmem_specs = [pl.BlockSpec(memory_space=pltpu.MemorySpace.VMEM)
                      for _ in range(1 + 2 * L)]
        out = pl.pallas_call(
            kernel,
            out_shape=jax.ShapeDtypeStruct((B_pad, n_out_pad), jnp.float32),
            in_specs=vmem_specs,
            out_specs=pl.BlockSpec(memory_space=pltpu.MemorySpace.VMEM),
            compiler_params=pltpu.CompilerParams(
                vmem_limit_bytes=_vmem_limit_bytes(B_pad, k0_pad, packed_params)),
        )(x_p, *flat_params)
        return out[:B, :n_actions]
    else:
        # Large batch: tile the batch axis ("parallel" -> megacore sharding on
        # v7x; B > TM guarantees >= 2 grid steps). Weight/bias blocks have a
        # constant index_map, so they stay resident across batch tiles. The
        # last (partial) batch block is handled by Pallas; no batch padding.
        x_p = jnp.pad(x.astype(jnp.float32), ((0, 0), (0, k0_pad - n_obs)))
        in_specs = [pl.BlockSpec((TM, k0_pad), lambda i: (i, 0))]
        for (w_p, b_p) in packed_params:
            in_specs.append(pl.BlockSpec(w_p.shape, lambda i: (0, 0)))
            in_specs.append(pl.BlockSpec(b_p.shape, lambda i: (0, 0)))
        out = pl.pallas_call(
            kernel,
            out_shape=jax.ShapeDtypeStruct((B, n_out_pad), jnp.float32),
            grid=(pl.cdiv(B, TM),),
            in_specs=in_specs,
            out_specs=pl.BlockSpec((TM, n_out_pad), lambda i: (i, 0)),
            compiler_params=pltpu.CompilerParams(
                dimension_semantics=("parallel",),
                vmem_limit_bytes=_vmem_limit_bytes(TM, k0_pad, packed_params)),
        )(x_p, *flat_params)
        return out[:, :n_actions]


def init_dqn_params(key, n_observations, n_actions, hidden_layers_neurons):
    """Deterministic init mimicking nn.Linear default (uniform(-1/sqrt(fan_in)))."""
    hidden_layers_neurons = [v for v in hidden_layers_neurons if v != 0]
    assert len(hidden_layers_neurons) > 0, "hidden_layers_neurons len was not > 0."
    dims = [n_observations] + hidden_layers_neurons + [n_actions]
    params = []
    for i in range(len(dims) - 1):
        fan_in, fan_out = dims[i], dims[i + 1]
        key, kw, kb = jax.random.split(key, 3)
        bound = 1.0 / (fan_in ** 0.5)
        w = jax.random.uniform(kw, (fan_in, fan_out), jnp.float32, -bound, bound)
        b = jax.random.uniform(kb, (fan_out,), jnp.float32, -bound, bound)
        params.append((w, b))
    return params


def _reference(x, params):
    out = x
    for (w, b) in params:
        out = jnp.maximum(out @ w + b, 0.0)
    return out


if __name__ == "__main__":
    key = jax.random.PRNGKey(0)
    n_observations = 16
    n_actions = 8
    hidden_layers_neurons = [32, 32]

    params = init_dqn_params(key, n_observations, n_actions, hidden_layers_neurons)
    packed = pack_dqn_params(params)  # packed ONCE, reused for every forward

    # --- small batch: single-block VMEM path ---
    key, kx = jax.random.split(key)
    x_small = jax.random.normal(kx, (2, n_observations), jnp.float32)
    out_small = jax.block_until_ready(
        dqn_forward(x_small, packed, n_actions=n_actions))
    ref_small = _reference(x_small, params)
    assert out_small.shape == (2, n_actions)
    assert jnp.allclose(out_small, ref_small, atol=5e-2, rtol=5e-2), (
        f"small-batch max abs err {jnp.max(jnp.abs(out_small - ref_small))}")

    # --- larger batch: tiled "parallel" grid path (exercises the partial last block) ---
    key, kx = jax.random.split(key)
    x_big = jax.random.normal(kx, (600, n_observations), jnp.float32)
    out_big = jax.block_until_ready(
        dqn_forward(x_big, packed, n_actions=n_actions))
    ref_big = _reference(x_big, params)
    assert out_big.shape == (600, n_actions)
    assert jnp.allclose(out_big, ref_big, atol=5e-2, rtol=5e-2), (
        f"large-batch max abs err {jnp.max(jnp.abs(out_big - ref_big))}")

    print("KERNEL_OK")
</pallas_src>

<mosaic_0001>
module attributes {stable_mosaic.version = 11 : i64} {
  func.func @_fused_mlp_kernel(%arg0: memref<8x128xf32, #tpu.memory_space<vmem>>, %arg1: memref<128x128xbf16, #tpu.memory_space<vmem>>, %arg2: memref<1x128xf32, #tpu.memory_space<vmem>>, %arg3: memref<128x128xbf16, #tpu.memory_space<vmem>>, %arg4: memref<1x128xf32, #tpu.memory_space<vmem>>, %arg5: memref<128x128xbf16, #tpu.memory_space<vmem>>, %arg6: memref<1x128xf32, #tpu.memory_space<vmem>>, %arg7: memref<8x128xf32, #tpu.memory_space<vmem>>) attributes {dimension_semantics = [], scalar_prefetch = 0 : i64, scratch_operands = 0 : i64, tpu.core_type = #tpu.core_type<tc>} {
    %c0 = arith.constant 0 : index
    %c0_0 = arith.constant 0 : index
    %0 = vector.load %arg0[%c0, %c0_0] : memref<8x128xf32, #tpu.memory_space<vmem>>, vector<8x128xf32>
    %c0_1 = arith.constant 0 : index
    %c0_2 = arith.constant 0 : index
    %1 = vector.load %arg1[%c0_1, %c0_2] : memref<128x128xbf16, #tpu.memory_space<vmem>>, vector<128x128xbf16>
    %c0_3 = arith.constant 0 : index
    %c0_4 = arith.constant 0 : index
    %2 = vector.load %arg2[%c0_3, %c0_4] : memref<1x128xf32, #tpu.memory_space<vmem>>, vector<1x128xf32>
    %3 = arith.truncf %0 : vector<8x128xf32> to vector<8x128xbf16>
    %cst = arith.constant dense<0.000000e+00> : vector<8x128xf32>
    %4 = tpu.matmul %3, %1, %cst {dimension_numbers = #tpu.dot_dimension_numbers<[1], [0], [0], [1], [0, 0, 1, 1], [], []>} : vector<8x128xbf16>, vector<128x128xbf16>, vector<8x128xf32> -> vector<8x128xf32>
    %5 = vector.broadcast %2 : vector<1x128xf32> to vector<8x128xf32>
    %6 = arith.addf %4, %5 : vector<8x128xf32>
    %cst_5 = arith.constant 0.000000e+00 : f32
    %7 = vector.broadcast %cst_5 : f32 to vector<8x128xf32>
    %8 = arith.maximumf %6, %7 : vector<8x128xf32>
    %c0_6 = arith.constant 0 : index
    %c0_7 = arith.constant 0 : index
    %9 = vector.load %arg3[%c0_6, %c0_7] : memref<128x128xbf16, #tpu.memory_space<vmem>>, vector<128x128xbf16>
    %c0_8 = arith.constant 0 : index
    %c0_9 = arith.constant 0 : index
    %10 = vector.load %arg4[%c0_8, %c0_9] : memref<1x128xf32, #tpu.memory_space<vmem>>, vector<1x128xf32>
    %11 = arith.truncf %8 : vector<8x128xf32> to vector<8x128xbf16>
    %cst_10 = arith.constant dense<0.000000e+00> : vector<8x128xf32>
    %12 = tpu.matmul %11, %9, %cst_10 {dimension_numbers = #tpu.dot_dimension_numbers<[1], [0], [0], [1], [0, 0, 1, 1], [], []>} : vector<8x128xbf16>, vector<128x128xbf16>, vector<8x128xf32> -> vector<8x128xf32>
    %13 = vector.broadcast %10 : vector<1x128xf32> to vector<8x128xf32>
    %14 = arith.addf %12, %13 : vector<8x128xf32>
    %cst_11 = arith.constant 0.000000e+00 : f32
    %15 = vector.broadcast %cst_11 : f32 to vector<8x128xf32>
    %16 = arith.maximumf %14, %15 : vector<8x128xf32>
    %c0_12 = arith.constant 0 : index
    %c0_13 = arith.constant 0 : index
    %17 = vector.load %arg5[%c0_12, %c0_13] : memref<128x128xbf16, #tpu.memory_space<vmem>>, vector<128x128xbf16>
    %c0_14 = arith.constant 0 : index
    %c0_15 = arith.constant 0 : index
    %18 = vector.load %arg6[%c0_14, %c0_15] : memref<1x128xf32, #tpu.memory_space<vmem>>, vector<1x128xf32>
    %19 = arith.truncf %16 : vector<8x128xf32> to vector<8x128xbf16>
    %cst_16 = arith.constant dense<0.000000e+00> : vector<8x128xf32>
    %20 = tpu.matmul %19, %17, %cst_16 {dimension_numbers = #tpu.dot_dimension_numbers<[1], [0], [0], [1], [0, 0, 1, 1], [], []>} : vector<8x128xbf16>, vector<128x128xbf16>, vector<8x128xf32> -> vector<8x128xf32>
    %21 = vector.broadcast %18 : vector<1x128xf32> to vector<8x128xf32>
    %22 = arith.addf %20, %21 : vector<8x128xf32>
    %cst_17 = arith.constant 0.000000e+00 : f32
    %23 = vector.broadcast %cst_17 : f32 to vector<8x128xf32>
    %24 = arith.maximumf %22, %23 : vector<8x128xf32>
    %c0_18 = arith.constant 0 : index
    %c0_19 = arith.constant 0 : index
    %25 = vector.load %arg7[%c0_18, %c0_19] : memref<8x128xf32, #tpu.memory_space<vmem>>, vector<8x128xf32>
    tpu.vector_store %arg7[%c0_18, %c0_19], %24 {strides = array<i32>} : memref<8x128xf32, #tpu.memory_space<vmem>>, vector<8x128xf32>,
    return
  }
}

</mosaic_0001>

<bundles_post_ra>
// kernel: dqn_forward.1
= control target key start
LH: loop header
LB: loop body
LE: loop exit
PB: predicated region body
PF: predicated region fallthrough
CT: control target
= control target key end

     0   :  { %12 = vsyncpa [#allocation3], 0  ;;  %s603_s0 = inlined_call_operand.vmem [shape: f32[8,128], index: 0, kind: input, shape index: {}]   ;;  %s604_s1 = inlined_call_operand.hbm [shape: bf16[128,128], index: 1, kind: input, shape index: {}]   ;;  %s605_s2 = inlined_call_operand.vmem [shape: f32[1,128], index: 2, kind: input, shape index: {}]   ;;  %s606_s3 = inlined_call_operand.hbm [shape: bf16[128,128], index: 3, kind: input, shape index: {}]   ;;  %s607_s4 = inlined_call_operand.vmem [shape: f32[1,128], index: 4, kind: input, shape index: {}]   ;;  %s608_s5 = inlined_call_operand.hbm [shape: bf16[128,128], index: 5, kind: input, shape index: {}]   ;;  %s609_s6 = inlined_call_operand.vmem [shape: f32[1,128], index: 6, kind: input, shape index: {}]   ;;  %s610_s7 = inlined_call_operand.vmem [shape: f32[8,128], index: 7, kind: output, shape index: {}]  }
   0x1   :  { %13 = vsyncpa [#allocation5], 0  ;;  %s35_s26 = sshll.u32 %s606_s3, 4  ;;  %s534_s27 = smov [#allocation4]   ;;  %s36_s26 = int_to_ptr.hbm [resolvable:$true] %s35_s26 }
   0x2   :  { %s37_s28 = sshll.u32 %s534_s27, 4  ;;  %s20_s8 = sshll.u32 %s604_s1, 4  ;;  %s38_s28 = int_to_ptr.vmem [resolvable:$true] %s37_s28  ;;  %s21_s8 = int_to_ptr.hbm [resolvable:$true] %s20_s8 }
   0x3   :  { %s535_s9 = smov 64   ;;  %s536_s10 = smov 4  }
   0x4   :  { %43 = dma.hbm_to_vmem [thread:$0]  %s36_s26, 1024, %s38_s28, [#allocation5], %s535_s9, %s535_s9, %s536_s10  }
   0x5   :  { %s537_s11 = smov [#allocation2]   ;;  %s50_s15 = sshll.u32 %s608_s5, 4  ;;  %s51_s15 = int_to_ptr.hbm [resolvable:$true] %s50_s15 }
   0x6   :  { %s22_s12 = sshll.u32 %s537_s11, 4  ;;  %s538_s3 = smov [#allocation6]   ;;  %s23_s12 = int_to_ptr.vmem [resolvable:$true] %s22_s12 }
   0x7   :  { %28 = dma.hbm_to_vmem [thread:$0]  %s21_s8, 1024, %s23_s12, [#allocation3], %s535_s9, %s535_s9, %s536_s10  }
   0x8   :  { %s52_s16 = sshll.u32 %s538_s3, 4  ;;  %s53_s16 = int_to_ptr.vmem [resolvable:$true] %s52_s16 }
   0x9   :  { %58 = dma.hbm_to_vmem [thread:$0]  %s51_s15, 1024, %s53_s16, [#allocation5], %s535_s9, %s535_s9, %s536_s10  }
   0xa   :  { %530 = dma.done.wait [#allocation3], 1024  }
   0xb   :  { %531 = vsyncadd [#allocation3], 4294966272 }
   0xc   :  { %532 = dma.done.wait [#allocation5], 2048  }
   0xd   :  { %533 = vsyncadd [#allocation5], 4294965248  ;;  %v433_v0 = vld [vmem:[#allocation2 + $0x38] sm:$0xff]  ;;  %v432_v1 = vld [vmem:[#allocation2 + $0x30] sm:$0xff] }
   0xe   :  { %143 = vmatpush.bf16.msra.mxu0 %v433_v0  ;;  %v441_v2 = vld [vmem:[#allocation4 + $0x38] sm:$0xff]  ;;  %v440_v3 = vld [vmem:[#allocation4 + $0x30] sm:$0xff]  ;;  %v431_v4 = vld [vmem:[#allocation2 + $0x28] sm:$0xff] }
   0xf   :  { %226 = vmatpush.bf16.msra.mxu1 %v441_v2  ;;  %v439_v5 = vld [vmem:[#allocation4 + $0x28] sm:$0xff]  ;;  %v430_v6 = vld [vmem:[#allocation2 + $0x20] sm:$0xff]  ;;  %v429_v8 = vld [vmem:[#allocation2 + $0x18] sm:$0xff] }
  0x10   :  { %v438_v7 = vld [vmem:[#allocation4 + $0x20] sm:$0xff]  ;;  %v437_v9 = vld [vmem:[#allocation4 + $0x18] sm:$0xff]  ;;  %v428_v10 = vld [vmem:[#allocation2 + $0x10] sm:$0xff] }
  0x11   :  { %v436_v11 = vld [vmem:[#allocation4 + $0x10] sm:$0xff]  ;;  %v427_v12 = vld [vmem:[#allocation2 + $0x8] sm:$0xff]  ;;  %v426_v13 = vld [vmem:[#allocation2] sm:$0xff] }
  0x12   :  { %144 = vmatpush.bf16.msra.mxu0 %v432_v1  ;;  %v73_v14 = vld [vmem:[%s603_s0] sm:$0xff]  ;;  %v435_v16 = vld [vmem:[#allocation4 + $0x8] sm:$0xff]  ;;  %v449_v18 = vld [vmem:[#allocation6 + $0x38] sm:$0xff] }
  0x13   :  { %227 = vmatpush.bf16.msra.mxu1 %v440_v3  ;;  %v91_v15 = vpack.c.bf16 %v73_v14, %v73_v14  ;;  %v434_v17 = vld [vmem:[#allocation4] sm:$0xff]  ;;  %309 = vmatpush.bf16.msra.mxu2 %v449_v18  ;;  %v448_v19 = vld [vmem:[#allocation6 + $0x30] sm:$0xff]  ;;  %v447_v20 = vld [vmem:[#allocation6 + $0x28] sm:$0xff] }
  0x14   :  { %v446_v21 = vld [vmem:[#allocation6 + $0x20] sm:$0xff]  ;;  %v445_v22 = vld [vmem:[#allocation6 + $0x18] sm:$0xff]  ;;  %v444_v23 = vld [vmem:[#allocation6 + $0x10] sm:$0xff] }
  0x15   :  { %v455_v24 = vld [vmem:[%s605_s2] ss:$0 sm:$0xff]  ;;  %v443_v30 = vld [vmem:[#allocation6 + $0x8] sm:$0xff] }
  0x16   :  { %145 = vmatpush.bf16.msra.mxu0 %v431_v4  ;;  %v442_v31 = vld [vmem:[#allocation6] sm:$0xff] }
  0x17   :  { %228 = vmatpush.bf16.msra.mxu1 %v439_v5  ;;  %310 = vmatpush.bf16.msra.mxu2 %v448_v19  ;;  %v456_v32 = vld [vmem:[%s607_s4] ss:$0 sm:$0xff] }
  0x18   :  { %v457_v38 = vld [vmem:[%s609_s6] ss:$0 sm:$0xff] }
  0x1a   :  { %146 = vmatpush.bf16.msra.mxu0 %v430_v6 }
  0x1b   :  { %229 = vmatpush.bf16.msra.mxu1 %v438_v7  ;;  %311 = vmatpush.bf16.msra.mxu2 %v447_v20 }
  0x1e   :  { %147 = vmatpush.bf16.msra.mxu0 %v429_v8 }
  0x1f   :  { %230 = vmatpush.bf16.msra.mxu1 %v437_v9  ;;  %312 = vmatpush.bf16.msra.mxu2 %v446_v21 }
  0x22   :  { %148 = vmatpush.bf16.msra.mxu0 %v428_v10 }
  0x23   :  { %231 = vmatpush.bf16.msra.mxu1 %v436_v11  ;;  %313 = vmatpush.bf16.msra.mxu2 %v445_v22 }
  0x26   :  { %149 = vmatpush.bf16.msra.mxu0 %v427_v12 }
  0x27   :  { %232 = vmatpush.bf16.msra.mxu1 %v435_v16  ;;  %314 = vmatpush.bf16.msra.mxu2 %v444_v23 }
  0x2a   :  { %150 = vmatpush.bf16.msra.mxu0 %v426_v13 }
  0x2b   :  { %233 = vmatpush.bf16.msra.mxu1 %v434_v17  ;;  %315 = vmatpush.bf16.msra.mxu2 %v443_v30 }
  0x2d   :  { %151 = vmatmul.bf16.vlgmr.msra.gmra.mxu0 %v91_v15 }
  0x2f   :  { %316 = vmatpush.bf16.msra.mxu2 %v442_v31 }
  0xaa   :  { %v152_v25 = vpop.f32.mrf.mxu0 }
  0xab   :  { %v153_v26 = vadd.f32 %v455_v24, %v152_v25 }
  0xad   :  { %v156_v27 = vmax.f32 %v153_v26, 0.0 }
  0xaf   :  { %v174_v28 = vpack.c.bf16 %v156_v27, %v156_v27 }
  0xb1   :  { %234 = vmatmul.bf16.vlgmr.msra.gmra.mxu1 %v174_v28 }
  0xb2   :  { %v154_v29 = vpop.f32.mrf.mxu0 }
 0x12e   :  { %v235_v33 = vpop.f32.mrf.mxu1 }
 0x12f   :  { %v236_v34 = vadd.f32 %v456_v32, %v235_v33 }
 0x131   :  { %v239_v35 = vmax.f32 %v236_v34, 0.0 }
 0x133   :  { %v257_v36 = vpack.c.bf16 %v239_v35, %v239_v35 }
 0x135   :  { %317 = vmatmul.bf16.vlgmr.msra.gmra.mxu2 %v257_v36 }
 0x136   :  { %v237_v37 = vpop.f32.mrf.mxu1 }
 0x1b8   :  { %v318_v39 = vpop.f32.mrf.mxu2 }
 0x1b9   :  { %v319_v40 = vadd.f32 %v457_v38, %v318_v39 }
 0x1bb   :  { %v322_v41 = vmax.f32 %v319_v40, 0.0 }
 0x1bd   :  { %323 = vst [vmem:[%s610_s7] sm:$0xff] %v322_v41 }
 0x1c0   :  { %v320_v42 = vpop.f32.mrf.mxu2 }
 0x1c1   :  { %328 = vsyncpa [#allocation3], 1 }
 0x1c2   :  { %329 = vsyncpa [#allocation5], 1 }

</bundles_post_ra>
